<compile_context>
chip_gen: v6e
topology: v6e:2x2x1
jax: 0.10.0
libtpu: 0.0.40
codegen_flags: <defaults>
</compile_context>

<pallas_src>
import functools

import jax
import jax.numpy as jnp
from jax.experimental import pallas as pl
from jax.experimental.pallas import tpu as pltpu


# ----------------------------------------------------------------------------
# Fused kernel: ReLU -> transposed-conv matmul -> BatchNorm (stats + normalize)
# ----------------------------------------------------------------------------
def _fused_convt_bn_kernel(xs_ref, w_ref, g_ref, b_ref, o_ref, *, eps):
    # xs_ref: (N, K, M)   K = KH*KW*CI taps ((kh,kw,ci) ordering), M = OH*OW
    # w_ref:  (CO, K)     flipped / re-laid-out ConvTranspose2d weight
    # g_ref, b_ref: (CO, 1)  BatchNorm affine parameters
    # o_ref:  (N, CO, M)  normalized output, lane-dense (M on lanes)
    n_img, _, m = xs_ref.shape
    w = w_ref[...]

    convs = []
    for n in range(n_img):                        # static, tiny batch
        xn = jnp.maximum(xs_ref[n], 0.0)          # fused pre-activation ReLU
        convs.append(jnp.dot(w, xn, preferred_element_type=jnp.float32))  # (CO, M)

    # BatchNorm batch statistics, two-pass (mean first, then centered variance).
    inv_count = 1.0 / (n_img * m)
    mean = sum(jnp.sum(c, axis=1, keepdims=True) for c in convs) * inv_count
    var = sum(jnp.sum((c - mean) * (c - mean), axis=1, keepdims=True)
              for c in convs) * inv_count         # biased variance (PyTorch norm)
    scale = g_ref[...] * jax.lax.rsqrt(var + eps)  # (CO, 1)
    shift = b_ref[...] - mean * scale

    for n in range(n_img):
        o_ref[n] = convs[n] * scale + shift        # (CO, M) lane-dense store


# ----------------------------------------------------------------------------
# Wrapper
# ----------------------------------------------------------------------------
def conv_transpose2d_block(x, weight_t, gamma, beta, *, stride, padding,
                           output_padding=None, eps=1e-5, compute_dtype=None):
    """x: (N, CI, H, W) NCHW.  weight_t: (CI, CO, KH, KW) (PyTorch ConvTranspose2d)."""
    N, CI, H, W = x.shape
    wCI, CO, KH, KW = weight_t.shape
    assert wCI == CI
    assert padding <= KH - 1 and padding <= KW - 1
    if output_padding is None:                    # module spec default
        output_padding = 0 if stride == 1 else 1

    OH = (H - 1) * stride - 2 * padding + KH + output_padding
    OW = (W - 1) * stride - 2 * padding + KW + output_padding
    M = OH * OW
    Hd, Wd = (H - 1) * stride + 1, (W - 1) * stride + 1
    pbh, pah = KH - 1 - padding, KH - 1 - padding + output_padding
    pbw, paw = KW - 1 - padding, KW - 1 - padding + output_padding

    # --- small, input-sized wrapper glue: zero-insert + pad + tap-stack ------
    # TODO(synk): replace with the stride x stride polyphase decomposition to
    # keep operands input-sized and drop the structural-zero MXU work.
    xd = jnp.zeros((N, CI, Hd, Wd), x.dtype).at[:, :, ::stride, ::stride].set(x)
    xp = jnp.pad(xd, ((0, 0), (0, 0), (pbh, pah), (pbw, paw)))   # (N, CI, Hp, Wp)
    taps = [xp[:, :, kh:kh + OH, kw:kw + OW]                      # (N, CI, OH, OW)
            for kh in range(KH) for kw in range(KW)]
    xs = jnp.stack(taps, axis=1).reshape(N, KH * KW * CI, M)      # (N, K, M)

    # Equivalent forward-conv weight, laid out (CO, kh, kw, ci) to match xs's K axis.
    w_fwd = jnp.flip(weight_t, (2, 3)).transpose(1, 2, 3, 0)      # (CO, KH, KW, CI)
    w2 = w_fwd.reshape(CO, KH * KW * CI)

    if compute_dtype is not None:      # cast at the producer so DMA moves bf16
        xs = xs.astype(compute_dtype)
        w2 = w2.astype(compute_dtype)

    K = KH * KW * CI
    y = pl.pallas_call(
        functools.partial(_fused_convt_bn_kernel, eps=eps),
        grid=(1,),
        in_specs=[
            pl.BlockSpec((N, K, M), lambda i: (0, 0, 0)),
            pl.BlockSpec((CO, K), lambda i: (0, 0)),
            pl.BlockSpec((CO, 1), lambda i: (0, 0)),
            pl.BlockSpec((CO, 1), lambda i: (0, 0)),
        ],
        out_specs=pl.BlockSpec((N, CO, M), lambda i: (0, 0, 0)),
        out_shape=jax.ShapeDtypeStruct((N, CO, M), jnp.float32),
        compiler_params=pltpu.CompilerParams(
            dimension_semantics=("arbitrary",),
            vmem_limit_bytes=32 * 1024 * 1024),
    )(xs, w2,
      gamma.reshape(CO, 1).astype(jnp.float32),
      beta.reshape(CO, 1).astype(jnp.float32))

    # (N, CO, OH*OW) -> NCHW: contiguous, metadata-only reshape (no transpose copy).
    return y.reshape(N, CO, OH, OW)


# ----------------------------------------------------------------------------
# Pure-JAX reference (correctness check only)
# ----------------------------------------------------------------------------
def _reference(x, weight_t, gamma, beta, *, stride, padding, eps=1e-5):
    CI, CO, KH, KW = weight_t.shape
    out_pad = 0 if stride == 1 else 1
    xr = jnp.maximum(x, 0.0)
    w_fwd = jnp.flip(weight_t, (2, 3)).transpose(1, 0, 2, 3)   # (CO, CI, KH, KW)
    conv = jax.lax.conv_general_dilated(
        xr, w_fwd, window_strides=(1, 1),
        padding=[(KH - 1 - padding, KH - 1 - padding + out_pad),
                 (KW - 1 - padding, KW - 1 - padding + out_pad)],
        lhs_dilation=(stride, stride), rhs_dilation=(1, 1),
        dimension_numbers=("NCHW", "OIHW", "NCHW"),
        precision=jax.lax.Precision.HIGHEST)
    mean = conv.mean(axis=(0, 2, 3), keepdims=True)
    var = ((conv - mean) ** 2).mean(axis=(0, 2, 3), keepdims=True)
    xhat = (conv - mean) * jax.lax.rsqrt(var + eps)
    return xhat * gamma.reshape(1, CO, 1, 1) + beta.reshape(1, CO, 1, 1)


if __name__ == "__main__":
    # Module hyper-params (affine=True, preactivation=True)
    in_channels, out_channels = 4, 8
    kernel_size, padding, stride = 3, 1, 2

    N, H, W = 2, 8, 8
    key = jax.random.PRNGKey(0)
    kx, kw = jax.random.split(key)
    x = jax.random.normal(kx, (N, in_channels, H, W), jnp.float32)
    weight_t = jax.random.normal(
        kw, (in_channels, out_channels, kernel_size, kernel_size), jnp.float32) * 0.1
    gamma = jnp.ones((out_channels,), jnp.float32)   # BatchNorm2d(affine=True) init
    beta = jnp.zeros((out_channels,), jnp.float32)

    fwd = jax.jit(functools.partial(conv_transpose2d_block,
                                    stride=stride, padding=padding))
    out = jax.block_until_ready(fwd(x, weight_t, gamma, beta))

    # Expected output spatial size: (8-1)*2 - 2*1 + 3 + 1 = 16
    assert out.shape == (N, out_channels, 16, 16), out.shape

    ref = _reference(x, weight_t, gamma, beta, stride=stride, padding=padding)
    max_err = float(jnp.max(jnp.abs(out - ref)))
    assert max_err < 3e-2, max_err

    print("KERNEL_OK")
</pallas_src>

<mosaic_0001>
module attributes {stable_mosaic.version = 11 : i64} {
  func.func @_fused_convt_bn_kernel(%arg0: i32, %arg1: memref<2x36x256xf32, #tpu.memory_space<vmem>>, %arg2: memref<8x36xf32, #tpu.memory_space<vmem>>, %arg3: memref<8x1xf32, #tpu.memory_space<vmem>>, %arg4: memref<8x1xf32, #tpu.memory_space<vmem>>, %arg5: memref<2x8x256xf32, #tpu.memory_space<vmem>>) attributes {dimension_semantics = [#tpu.dimension_semantics<arbitrary>], iteration_bounds = array<i64: 1>, scalar_prefetch = 0 : i64, scratch_operands = 0 : i64, tpu.core_type = #tpu.core_type<tc>, window_params = [{pipeline_mode = #tpu.pipeline_mode<synchronous>, transform_indices = @transform_0, window_bounds = array<i64: 2, 36, 256>}, {pipeline_mode = #tpu.pipeline_mode<synchronous>, transform_indices = @transform_1, window_bounds = array<i64: 8, 36>}, {pipeline_mode = #tpu.pipeline_mode<synchronous>, transform_indices = @transform_2, window_bounds = array<i64: 8, 1>}, {pipeline_mode = #tpu.pipeline_mode<synchronous>, transform_indices = @transform_3, window_bounds = array<i64: 8, 1>}, {pipeline_mode = #tpu.pipeline_mode<synchronous>, transform_indices = @transform_4, window_bounds = array<i64: 2, 8, 256>}]} {
    %c0 = arith.constant 0 : index
    %c0_0 = arith.constant 0 : index
    %0 = vector.load %arg2[%c0, %c0_0] : memref<8x36xf32, #tpu.memory_space<vmem>>, vector<8x36xf32>
    %c0_1 = arith.constant 0 : index
    %c0_2 = arith.constant 0 : index
    %c0_3 = arith.constant 0 : index
    %1 = vector.load %arg1[%c0_1, %c0_2, %c0_3] : memref<2x36x256xf32, #tpu.memory_space<vmem>>, vector<1x36x256xf32>
    %2 = vector.shape_cast %1 : vector<1x36x256xf32> to vector<36x256xf32>
    %cst = arith.constant 0.000000e+00 : f32
    %3 = vector.broadcast %cst : f32 to vector<36x256xf32>
    %4 = arith.maximumf %2, %3 : vector<36x256xf32>
    %cst_4 = arith.constant dense<0.000000e+00> : vector<8x256xf32>
    %5 = tpu.matmul %0, %4, %cst_4 {dimension_numbers = #tpu.dot_dimension_numbers<[1], [0], [0], [1], [0, 0, 1, 1], [], []>} : vector<8x36xf32>, vector<36x256xf32>, vector<8x256xf32> -> vector<8x256xf32>
    %c1 = arith.constant 1 : index
    %c0_5 = arith.constant 0 : index
    %c0_6 = arith.constant 0 : index
    %6 = vector.load %arg1[%c1, %c0_5, %c0_6] : memref<2x36x256xf32, #tpu.memory_space<vmem>>, vector<1x36x256xf32>
    %7 = vector.shape_cast %6 : vector<1x36x256xf32> to vector<36x256xf32>
    %cst_7 = arith.constant 0.000000e+00 : f32
    %8 = vector.broadcast %cst_7 : f32 to vector<36x256xf32>
    %9 = arith.maximumf %7, %8 : vector<36x256xf32>
    %cst_8 = arith.constant dense<0.000000e+00> : vector<8x256xf32>
    %10 = tpu.matmul %0, %9, %cst_8 {dimension_numbers = #tpu.dot_dimension_numbers<[1], [0], [0], [1], [0, 0, 1, 1], [], []>} : vector<8x36xf32>, vector<36x256xf32>, vector<8x256xf32> -> vector<8x256xf32>
    %cst_9 = arith.constant dense<0.000000e+00> : vector<8xf32>
    %11 = vector.multi_reduction <add>, %5, %cst_9 [1] : vector<8x256xf32> to vector<8xf32>
    %12 = vector.shape_cast %11 : vector<8xf32> to vector<8x1xf32>
    %cst_10 = arith.constant 0.000000e+00 : f32
    %13 = vector.broadcast %cst_10 : f32 to vector<8x1xf32>
    %14 = arith.addf %13, %12 : vector<8x1xf32>
    %cst_11 = arith.constant dense<0.000000e+00> : vector<8xf32>
    %15 = vector.multi_reduction <add>, %10, %cst_11 [1] : vector<8x256xf32> to vector<8xf32>
    %16 = vector.shape_cast %15 : vector<8xf32> to vector<8x1xf32>
    %17 = arith.addf %14, %16 : vector<8x1xf32>
    %cst_12 = arith.constant 0.001953125 : f32
    %18 = vector.broadcast %cst_12 : f32 to vector<8x1xf32>
    %19 = arith.mulf %17, %18 : vector<8x1xf32>
    %20 = vector.broadcast %19 : vector<8x1xf32> to vector<8x256xf32>
    %21 = arith.subf %5, %20 : vector<8x256xf32>
    %22 = vector.broadcast %19 : vector<8x1xf32> to vector<8x256xf32>
    %23 = arith.subf %5, %22 : vector<8x256xf32>
    %24 = arith.mulf %21, %23 : vector<8x256xf32>
    %cst_13 = arith.constant dense<0.000000e+00> : vector<8xf32>
    %25 = vector.multi_reduction <add>, %24, %cst_13 [1] : vector<8x256xf32> to vector<8xf32>
    %26 = vector.shape_cast %25 : vector<8xf32> to vector<8x1xf32>
    %cst_14 = arith.constant 0.000000e+00 : f32
    %27 = vector.broadcast %cst_14 : f32 to vector<8x1xf32>
    %28 = arith.addf %27, %26 : vector<8x1xf32>
    %29 = vector.broadcast %19 : vector<8x1xf32> to vector<8x256xf32>
    %30 = arith.subf %10, %29 : vector<8x256xf32>
    %31 = vector.broadcast %19 : vector<8x1xf32> to vector<8x256xf32>
    %32 = arith.subf %10, %31 : vector<8x256xf32>
    %33 = arith.mulf %30, %32 : vector<8x256xf32>
    %cst_15 = arith.constant dense<0.000000e+00> : vector<8xf32>
    %34 = vector.multi_reduction <add>, %33, %cst_15 [1] : vector<8x256xf32> to vector<8xf32>
    %35 = vector.shape_cast %34 : vector<8xf32> to vector<8x1xf32>
    %36 = arith.addf %28, %35 : vector<8x1xf32>
    %cst_16 = arith.constant 0.001953125 : f32
    %37 = vector.broadcast %cst_16 : f32 to vector<8x1xf32>
    %38 = arith.mulf %36, %37 : vector<8x1xf32>
    %c0_17 = arith.constant 0 : index
    %c0_18 = arith.constant 0 : index
    %39 = vector.load %arg3[%c0_17, %c0_18] : memref<8x1xf32, #tpu.memory_space<vmem>>, vector<8x1xf32>
    %cst_19 = arith.constant 9.99999974E-6 : f32
    %40 = vector.broadcast %cst_19 : f32 to vector<8x1xf32>
    %41 = arith.addf %38, %40 : vector<8x1xf32>
    %42 = math.rsqrt %41 : vector<8x1xf32>
    %43 = arith.mulf %39, %42 : vector<8x1xf32>
    %c0_20 = arith.constant 0 : index
    %c0_21 = arith.constant 0 : index
    %44 = vector.load %arg4[%c0_20, %c0_21] : memref<8x1xf32, #tpu.memory_space<vmem>>, vector<8x1xf32>
    %45 = arith.mulf %19, %43 : vector<8x1xf32>
    %46 = arith.subf %44, %45 : vector<8x1xf32>
    %47 = vector.broadcast %43 : vector<8x1xf32> to vector<8x256xf32>
    %48 = arith.mulf %5, %47 : vector<8x256xf32>
    %49 = vector.broadcast %46 : vector<8x1xf32> to vector<8x256xf32>
    %50 = arith.addf %48, %49 : vector<8x256xf32>
    %c0_22 = arith.constant 0 : index
    %c0_23 = arith.constant 0 : index
    %c0_24 = arith.constant 0 : index
    %51 = vector.load %arg5[%c0_22, %c0_23, %c0_24] : memref<2x8x256xf32, #tpu.memory_space<vmem>>, vector<1x8x256xf32>
    %52 = vector.shape_cast %51 : vector<1x8x256xf32> to vector<8x256xf32>
    %53 = vector.shape_cast %50 : vector<8x256xf32> to vector<1x8x256xf32>
    tpu.vector_store %arg5[%c0_22, %c0_23, %c0_24], %53 {strides = array<i32>} : memref<2x8x256xf32, #tpu.memory_space<vmem>>, vector<1x8x256xf32>,
    %54 = vector.broadcast %43 : vector<8x1xf32> to vector<8x256xf32>
    %55 = arith.mulf %10, %54 : vector<8x256xf32>
    %56 = vector.broadcast %46 : vector<8x1xf32> to vector<8x256xf32>
    %57 = arith.addf %55, %56 : vector<8x256xf32>
    %c1_25 = arith.constant 1 : index
    %c0_26 = arith.constant 0 : index
    %c0_27 = arith.constant 0 : index
    %58 = vector.load %arg5[%c1_25, %c0_26, %c0_27] : memref<2x8x256xf32, #tpu.memory_space<vmem>>, vector<1x8x256xf32>
    %59 = vector.shape_cast %58 : vector<1x8x256xf32> to vector<8x256xf32>
    %60 = vector.shape_cast %57 : vector<8x256xf32> to vector<1x8x256xf32>
    tpu.vector_store %arg5[%c1_25, %c0_26, %c0_27], %60 {strides = array<i32>} : memref<2x8x256xf32, #tpu.memory_space<vmem>>, vector<1x8x256xf32>,
    return
  }
  func.func @transform_0(%arg0: i32) -> (i32, i32, i32) {
    %c0_i32 = arith.constant 0 : i32
    %c0_i32_0 = arith.constant 0 : i32
    %c0_i32_1 = arith.constant 0 : i32
    %c0_i32_2 = arith.constant 0 : i32
    return %c0_i32, %c0_i32_0, %c0_i32_1 : i32, i32, i32
  }
  func.func @transform_1(%arg0: i32) -> (i32, i32) {
    %c0_i32 = arith.constant 0 : i32
    %c0_i32_0 = arith.constant 0 : i32
    %c0_i32_1 = arith.constant 0 : i32
    return %c0_i32, %c0_i32_0 : i32, i32
  }
  func.func @transform_2(%arg0: i32) -> (i32, i32) {
    %c0_i32 = arith.constant 0 : i32
    %c0_i32_0 = arith.constant 0 : i32
    %c0_i32_1 = arith.constant 0 : i32
    return %c0_i32, %c0_i32_0 : i32, i32
  }
  func.func @transform_3(%arg0: i32) -> (i32, i32) {
    %c0_i32 = arith.constant 0 : i32
    %c0_i32_0 = arith.constant 0 : i32
    %c0_i32_1 = arith.constant 0 : i32
    return %c0_i32, %c0_i32_0 : i32, i32
  }
  func.func @transform_4(%arg0: i32) -> (i32, i32, i32) {
    %c0_i32 = arith.constant 0 : i32
    %c0_i32_0 = arith.constant 0 : i32
    %c0_i32_1 = arith.constant 0 : i32
    %c0_i32_2 = arith.constant 0 : i32
    return %c0_i32, %c0_i32_0, %c0_i32_1 : i32, i32, i32
  }
}

</mosaic_0001>

<bundles_post_ra>
// kernel: conv_transpose2d_block.1
= control target key start
LH: loop header
LB: loop body
LE: loop exit
PB: predicated region body
PF: predicated region fallthrough
CT: control target
= control target key end

     0   :  { %vm42_vm0 = vcmask 1043456   ;;  %v302_v3 = vmov 0.0   ;;  %vm38_vm1 = vcmask 293888   ;;  %v303_v62 = vmov 0   ;;  %s414_s0 = inlined_call_operand.vmem [shape: f32[2,36,256], index: 0, kind: input, shape index: {}]   ;;  %s415_s1 = inlined_call_operand.vmem [shape: f32[8,36], index: 1, kind: input, shape index: {}]   ;;  %s416_s2 = inlined_call_operand.vmem [shape: f32[8,1], index: 2, kind: input, shape index: {}]   ;;  %s417_s3 = inlined_call_operand.vmem [shape: f32[8,1], index: 3, kind: input, shape index: {}]   ;;  %s418_s4 = inlined_call_operand.vmem [shape: f32[2,8,256], index: 4, kind: output, shape index: {}]  }
   0x1   :  { %v27_v0 = vld [vmem:[%s414_s0 + $0x48] sm:$0xf]  ;;  %v26_v1 = vld [vmem:[%s414_s0 + $0x40] sm:$0xf]  ;;  %v25_v2 = vld [vmem:[%s414_s0 + $0x38] sm:$0xff]  ;;  %113 = vmatprep.mubr.f32.mxu0 %v302_v3  ;;  %211 = vmatprep.mubr.f32.mxu1 %v302_v3 }
   0x2   :  { %v37_v4 = vmax.f32 %v27_v0, 0.0  ;;  %v36_v5 = vmax.f32 %v26_v1, 0.0  ;;  %v35_v6 = vmax.f32 %v25_v2, 0.0  ;;  %v290_v7 = vld [vmem:[%s414_s0 + $0x98] sm:$0xf]  ;;  %v24_v8 = vld [vmem:[%s414_s0 + $0x30] sm:$0xff]  ;;  %298 = vset.pattern.permute.xlu0 %v303_v62  ;;  %299 = vset.pattern.permute.xlu1 %v303_v62 }
   0x3   :  { %v140_v9 = vmax.f32 %v290_v7, 0.0  ;;  %v34_v10 = vmax.f32 %v24_v8, 0.0  ;;  %v289_v11 = vld [vmem:[%s414_s0 + $0x90] sm:$0xf]  ;;  %v23_v12 = vld [vmem:[%s414_s0 + $0x28] sm:$0xff]  ;;  %v22_v17 = vld [vmem:[%s414_s0 + $0x20] sm:$0xff] }
   0x4   :  { %v288_v13 = vld [vmem:[%s414_s0 + $0x88] sm:$0xff]  ;;  %278 = vmatprep.subr.msk.mxu0 %vm42_vm0, %v37_v4  ;;  %v139_v14 = vmax.f32 %v289_v11, 0.0  ;;  %v33_v15 = vmax.f32 %v23_v12, 0.0  ;;  %v287_v18 = vld [vmem:[%s414_s0 + $0x80] sm:$0xff]  ;;  %v21_v19 = vld [vmem:[%s414_s0 + $0x18] sm:$0xff]  ;;  %v32_v20 = vmax.f32 %v22_v17, 0.0 }
   0x5   :  { %v138_v16 = vmax.f32 %v288_v13, 0.0  ;;  %279 = vmatpush1.msk.msra.mxu0 %vm42_vm0, %v36_v5  ;;  %291 = vmatprep.subr.msk.mxu1 %vm42_vm0, %v140_v9  ;;  %v137_v21 = vmax.f32 %v287_v18, 0.0  ;;  %v286_v22 = vld [vmem:[%s414_s0 + $0x78] sm:$0xff]  ;;  %v20_v23 = vld [vmem:[%s414_s0 + $0x10] sm:$0xff]  ;;  %v31_v25 = vmax.f32 %v21_v19, 0.0  ;;  %v19_v28 = vld [vmem:[%s414_s0 + $0x8] sm:$0xff] }
   0x6   :  { %v285_v24 = vld [vmem:[%s414_s0 + $0x70] sm:$0xff]  ;;  %73 = vmatprep.subr.mxu0 %v35_v6  ;;  %292 = vmatpush1.msk.msra.mxu1 %vm42_vm0, %v139_v14  ;;  %v136_v26 = vmax.f32 %v286_v22, 0.0  ;;  %v284_v29 = vld [vmem:[%s414_s0 + $0x68] sm:$0xff]  ;;  %v18_v30 = vld [vmem:[%s414_s0] sm:$0xff]  ;;  %v30_v31 = vmax.f32 %v20_v23, 0.0  ;;  %v29_v35 = vmax.f32 %v19_v28, 0.0 }
   0x7   :  { %v135_v27 = vmax.f32 %v285_v24, 0.0  ;;  %74 = vmatpush1.msra.mxu0 %v34_v10  ;;  %171 = vmatprep.subr.mxu1 %v138_v16  ;;  %v134_v32 = vmax.f32 %v284_v29, 0.0  ;;  %v283_v33 = vld [vmem:[%s414_s0 + $0x60] sm:$0xff]  ;;  %v282_v34 = vld [vmem:[%s414_s0 + $0x58] sm:$0xff]  ;;  %v281_v37 = vld [vmem:[%s414_s0 + $0x50] sm:$0xff]  ;;  %v28_v38 = vmax.f32 %v18_v30, 0.0 }
   0x8   :  { %75 = vmatprep.subr.mxu0 %v33_v15  ;;  %172 = vmatpush1.msra.mxu1 %v137_v21  ;;  %v133_v36 = vmax.f32 %v283_v33, 0.0  ;;  %v132_v39 = vmax.f32 %v282_v34, 0.0  ;;  %v131_v40 = vmax.f32 %v281_v37, 0.0  ;;  %v17_v41 = vld [vmem:[%s415_s1] sm:$0xff] }
   0x9   :  { %76 = vmatpush1.msra.mxu0 %v32_v20  ;;  %173 = vmatprep.subr.mxu1 %v136_v26  ;;  %v244_v4 = vld [vmem:[%s416_s2] sm:$0xff] }
   0xa   :  { %77 = vmatprep.subr.mxu0 %v31_v25  ;;  %174 = vmatpush1.msra.mxu1 %v135_v27  ;;  %v248_v7 = vld [vmem:[%s417_s3] sm:$0xff] }
   0xb   :  { %78 = vmatpush1.msra.mxu0 %v30_v31  ;;  %175 = vmatprep.subr.mxu1 %v134_v32 }
   0xc   :  { %79 = vmatprep.subr.mxu0 %v29_v35  ;;  %176 = vmatpush1.msra.mxu1 %v133_v36 }
   0xd   :  { %80 = vmatpush1.msra.mxu0 %v28_v38  ;;  %177 = vmatprep.subr.mxu1 %v132_v39 }
   0xe   :  { %280 = vmatmul.mubr.msk.f32.vlgmr.msra.gmra.mxu0 %vm38_vm1, %v17_v41  ;;  %178 = vmatpush1.msra.mxu1 %v131_v40 }
   0xf   :  { %293 = vmatmul.mubr.msk.f32.vlgmr.msra.gmra.mxu1 %vm38_vm1, %v17_v41 }
  0xce   :  { %v115_v42 = vpop.f32.mrf.mxu0 }
  0xcf   :  { %v213_v43 = vpop.f32.mrf.mxu1 }
  0xd0   :  { %v117_v44 = vpop.f32.mrf.mxu0 }
  0xd1   :  { %v218_v45 = vadd.f32 %v117_v44, %v115_v42  ;;  %v215_v46 = vpop.f32.mrf.mxu1 }
  0xd2   :  { %v222_v47 = vadd.f32 %v215_v46, %v213_v43 }
  0xd3   :  { %219 = vadd.xlane.f32.xlu0 %v218_v45 }
  0xd7   :  { %223 = vadd.xlane.f32.xlu0 %v222_v47 }
 0x15c   :  { %v220_v48 = vpop.xlane.xlu0 %219 }
 0x160   :  { %v224_v49 = vpop.xlane.xlu0 %223 }
 0x161   :  { %v225_v50 = vadd.f32 %v224_v49, %v220_v48 }
 0x163   :  { %v226_v51 = vmul.f32 0.001953125, %v225_v50 }
 0x165   :  { %v227_v52 = vsub.f32 %v115_v42, %v226_v51  ;;  %v228_v53 = vsub.f32 %v117_v44, %v226_v51  ;;  %v235_v54 = vsub.f32 %v213_v43, %v226_v51  ;;  %v236_v55 = vsub.f32 %v215_v46, %v226_v51 }
 0x167   :  { %v229_v56 = vmul.f32 %v227_v52, %v227_v52  ;;  %v230_v57 = vmul.f32 %v228_v53, %v228_v53  ;;  %v237_v59 = vmul.f32 %v235_v54, %v235_v54  ;;  %v238_v60 = vmul.f32 %v236_v55, %v236_v55 }
 0x169   :  { %v231_v58 = vadd.f32 %v230_v57, %v229_v56  ;;  %v239_v61 = vadd.f32 %v238_v60, %v237_v59 }
 0x16b   :  { %232 = vadd.xlane.f32.xlu1 %v231_v58 }
 0x16f   :  { %240 = vadd.xlane.f32.xlu1 %v239_v61 }
 0x1f4   :  { %v233_v63 = vpop.xlane.xlu1 %232 }
 0x1f8   :  { %v241_v0 = vpop.xlane.xlu1 %240 }
 0x1f9   :  { %v242_v1 = vadd.f32 %v241_v0, %v233_v63 }
 0x1fb   :  { %v243_v2 = vmul.f32 0.001953125, %v242_v1 }
 0x1fd   :  { %v245_v3 = vadd.f32 1e-05, %v243_v2 }
 0x1ff   :  { %300 = vrsqrt.f32 %v245_v3 }
 0x20c   :  { %v301_v5 = vpop.eup %300 }
 0x20d   :  { %v247_v6 = vmul.f32 %v301_v5, %v244_v4 }
 0x20f   :  { %253 = vperm.xlu0 %298, %v247_v6   ;;  %v249_v8 = vmul.f32 %v247_v6, %v226_v51 }
 0x211   :  { %v250_v9 = vsub.f32 %v248_v7, %v249_v8 }
 0x213   :  { %260 = vperm.xlu1 %299, %v250_v9  }
 0x28a   :  { %v254_v10 = vpop.permute.xlu0 %253 }
 0x28b   :  { %v256_v11 = vmul.f32 %v254_v10, %v115_v42  ;;  %v257_v12 = vmul.f32 %v254_v10, %v117_v44  ;;  %v267_v13 = vmul.f32 %v254_v10, %v213_v43  ;;  %v268_v14 = vmul.f32 %v254_v10, %v215_v46 }
 0x28e   :  { %v261_v15 = vpop.permute.xlu1 %260 }
 0x28f   :  { %v263_v16 = vadd.f32 %v261_v15, %v256_v11  ;;  %v264_v17 = vadd.f32 %v261_v15, %v257_v12  ;;  %v269_v18 = vadd.f32 %v267_v13, %v261_v15  ;;  %v270_v19 = vadd.f32 %v268_v14, %v261_v15 }
 0x291   :  { %265 = vst [vmem:[%s418_s4] sm:$0xff] %v263_v16  ;;  %266 = vst [vmem:[%s418_s4 + $0x8] sm:$0xff] %v264_v17 }
 0x292   :  { %294 = vst [vmem:[%s418_s4 + $0x10] sm:$0xff] %v269_v18  ;;  %295 = vst [vmem:[%s418_s4 + $0x18] sm:$0xff] %v270_v19 }

</bundles_post_ra>
